<compile_context>
chip_gen: v6e
topology: v6e:2x2x1
jax: 0.10.0
libtpu: 0.0.40
codegen_flags: <defaults>
</compile_context>

<pallas_src>
import jax
import jax.numpy as jnp
from jax.experimental import pallas as pl
from jax.experimental.pallas import tpu as pltpu


def sinenet_kernel(x_ref, w1_ref, b1_ref, w2_ref, b2_ref, o_ref):
    # x_ref  : [1, TN]   (batch tile on lanes)
    # w1_ref : [H, 1]    (fc1.weight, H on sublanes)
    # b1_ref : [H, 1]    (fc1.bias)
    # w2_ref : [H, 1]    (fc2.weight.T)
    # b2_ref : [1]       (fc2.bias, SMEM scalar)
    # o_ref  : [1, TN]
    x = x_ref[...]                                             # [1, TN]
    # fc1 + sigmoid: VPU broadcast-multiply (outer product), EUP sigmoid.
    h = jax.nn.sigmoid(w1_ref[...] * x + b1_ref[...])          # [H, TN]
    # fc2: elementwise multiply + sublane reduce over H (no MXU).
    y = jnp.sum(h * w2_ref[...], axis=0, keepdims=True)        # [1, TN]
    o_ref[...] = (y + b2_ref[0]).astype(o_ref.dtype)


def sinenet_forward(x, w1, b1, w2, b2, *, tile_n=512):
    """x: [N, 1] float32; PyTorch-layout params:
       w1: [H, 1] (fc1.weight), b1: [H], w2: [1, H] (fc2.weight), b2: [1].
       Returns [N, 1] float32.

    NOTE: for tiny batches (N ~ 8) a plain XLA expression is cheaper than a
    Pallas launch; this kernel targets the large-N (mem-bound) regime.
    """
    n = x.shape[0]
    h = w1.shape[0]

    # Layout plumbing in the wrapper (not the kernel): batch -> lanes,
    # hidden -> sublanes.
    x_t = x.reshape(1, n)                      # [1, N]
    w1_c = w1.reshape(h, 1).astype(jnp.float32)
    b1_c = b1.reshape(h, 1).astype(jnp.float32)
    w2_c = w2.reshape(h, 1).astype(jnp.float32)   # fc2.weight.T
    b2_c = b2.reshape(1).astype(jnp.float32)

    # Pad batch to a multiple of the lane tile so every block is full and
    # lane-dense (128-divisible).
    tn = tile_n
    n_pad = pl.cdiv(n, tn) * tn
    if n_pad != n:
        x_t = jnp.pad(x_t, ((0, 0), (0, n_pad - n)))

    out = pl.pallas_call(
        sinenet_kernel,
        out_shape=jax.ShapeDtypeStruct((1, n_pad), jnp.float32),
        grid=(n_pad // tn,),
        in_specs=[
            pl.BlockSpec((1, tn), lambda i: (0, i)),          # x tile (lane-dense)
            pl.BlockSpec((h, 1), lambda i: (0, 0)),           # w1, resident
            pl.BlockSpec((h, 1), lambda i: (0, 0)),           # b1, resident
            pl.BlockSpec((h, 1), lambda i: (0, 0)),           # w2, resident
            pl.BlockSpec(memory_space=pltpu.MemorySpace.SMEM),  # b2 scalar
        ],
        out_specs=pl.BlockSpec((1, tn), lambda i: (0, i)),
        compiler_params=pltpu.CompilerParams(
            dimension_semantics=("parallel",),
        ),
    )(x_t, w1_c, b1_c, w2_c, b2_c)

    return out[:, :n].reshape(n, 1)


def init_params(key, n_hidden_neurons):
    # Deterministic init mimicking torch.nn.Linear (PyTorch parameter layout):
    # U(-1/sqrt(fan_in), 1/sqrt(fan_in))
    k1, k2, k3, k4 = jax.random.split(key, 4)
    bound1 = 1.0  # fan_in = 1
    w1 = jax.random.uniform(k1, (n_hidden_neurons, 1), jnp.float32, -bound1, bound1)
    b1 = jax.random.uniform(k2, (n_hidden_neurons,), jnp.float32, -bound1, bound1)
    bound2 = 1.0 / jnp.sqrt(float(n_hidden_neurons))
    w2 = jax.random.uniform(k3, (1, n_hidden_neurons), jnp.float32, -bound2, bound2)
    b2 = jax.random.uniform(k4, (1,), jnp.float32, -bound2, bound2)
    return w1, b1, w2, b2


if __name__ == "__main__":
    key = jax.random.PRNGKey(0)
    k_x, k_p = jax.random.split(key)

    n_hidden = 32
    batch = 2048          # 4 lane-dense tiles of 512; still tiny (8 KiB of input)

    # Scalar samples (points on a sine curve), PyTorch shape [N, 1]
    x = jax.random.uniform(k_x, (batch, 1), jnp.float32, -3.0, 3.0)

    w1, b1, w2, b2 = init_params(k_p, n_hidden)

    out = sinenet_forward(x, w1, b1, w2, b2)
    out = jax.block_until_ready(out)

    # Reference check in plain JAX with identical math / params (PyTorch layout).
    ref = jax.nn.sigmoid(x @ w1.T + b1[None, :]) @ w2.T + b2[None, :]
    assert out.shape == (batch, 1)
    assert jnp.allclose(out, ref, atol=1e-5, rtol=1e-5)

    print("KERNEL_OK")
</pallas_src>

<mosaic_0001>
module attributes {stable_mosaic.version = 11 : i64} {
  func.func @sinenet_kernel(%arg0: i32, %arg1: memref<1x512xf32, #tpu.memory_space<vmem>>, %arg2: memref<32x1xf32, #tpu.memory_space<vmem>>, %arg3: memref<32x1xf32, #tpu.memory_space<vmem>>, %arg4: memref<32x1xf32, #tpu.memory_space<vmem>>, %arg5: memref<1xf32, #tpu.memory_space<smem>>, %arg6: memref<1x512xf32, #tpu.memory_space<vmem>>) attributes {dimension_semantics = [#tpu.dimension_semantics<parallel>], iteration_bounds = array<i64: 4>, scalar_prefetch = 0 : i64, scratch_operands = 0 : i64, tpu.core_type = #tpu.core_type<tc>, window_params = [{transform_indices = @transform_0, window_bounds = array<i64: 1, 512>}, {pipeline_mode = #tpu.pipeline_mode<synchronous>, transform_indices = @transform_1, window_bounds = array<i64: 32, 1>}, {pipeline_mode = #tpu.pipeline_mode<synchronous>, transform_indices = @transform_2, window_bounds = array<i64: 32, 1>}, {pipeline_mode = #tpu.pipeline_mode<synchronous>, transform_indices = @transform_3, window_bounds = array<i64: 32, 1>}, {transform_indices = @transform_4, window_bounds = array<i64: 1>}, {transform_indices = @transform_5, window_bounds = array<i64: 1, 512>}]} {
    %c0 = arith.constant 0 : index
    %c0_0 = arith.constant 0 : index
    %0 = vector.load %arg1[%c0, %c0_0] : memref<1x512xf32, #tpu.memory_space<vmem>>, vector<1x512xf32>
    %c0_1 = arith.constant 0 : index
    %c0_2 = arith.constant 0 : index
    %1 = vector.load %arg2[%c0_1, %c0_2] : memref<32x1xf32, #tpu.memory_space<vmem>>, vector<32x1xf32>
    %2 = vector.broadcast %1 : vector<32x1xf32> to vector<32x512xf32>
    %3 = vector.broadcast %0 : vector<1x512xf32> to vector<32x512xf32>
    %4 = arith.mulf %2, %3 : vector<32x512xf32>
    %c0_3 = arith.constant 0 : index
    %c0_4 = arith.constant 0 : index
    %5 = vector.load %arg3[%c0_3, %c0_4] : memref<32x1xf32, #tpu.memory_space<vmem>>, vector<32x1xf32>
    %6 = vector.broadcast %5 : vector<32x1xf32> to vector<32x512xf32>
    %7 = arith.addf %4, %6 : vector<32x512xf32>
    %8 = arith.negf %7 : vector<32x512xf32>
    %9 = math.exp %8 : vector<32x512xf32>
    %cst = arith.constant 1.000000e+00 : f32
    %10 = vector.broadcast %cst : f32 to vector<32x512xf32>
    %11 = arith.addf %10, %9 : vector<32x512xf32>
    %12 = arith.divf %10, %11 : vector<32x512xf32>
    %c0_5 = arith.constant 0 : index
    %c0_6 = arith.constant 0 : index
    %13 = vector.load %arg4[%c0_5, %c0_6] : memref<32x1xf32, #tpu.memory_space<vmem>>, vector<32x1xf32>
    %14 = vector.broadcast %13 : vector<32x1xf32> to vector<32x512xf32>
    %15 = arith.mulf %12, %14 : vector<32x512xf32>
    %cst_7 = arith.constant dense<0.000000e+00> : vector<512xf32>
    %16 = vector.multi_reduction <add>, %15, %cst_7 [0] : vector<32x512xf32> to vector<512xf32>
    %17 = vector.shape_cast %16 : vector<512xf32> to vector<1x512xf32>
    %c0_8 = arith.constant 0 : index
    %18 = memref.load %arg5[%c0_8] : memref<1xf32, #tpu.memory_space<smem>>
    %19 = vector.broadcast %18 : f32 to vector<1x512xf32>
    %20 = arith.addf %17, %19 : vector<1x512xf32>
    %c0_9 = arith.constant 0 : index
    %c0_10 = arith.constant 0 : index
    %21 = vector.load %arg6[%c0_9, %c0_10] : memref<1x512xf32, #tpu.memory_space<vmem>>, vector<1x512xf32>
    tpu.vector_store %arg6[%c0_9, %c0_10], %20 {strides = array<i32>} : memref<1x512xf32, #tpu.memory_space<vmem>>, vector<1x512xf32>,
    return
  }
  func.func @transform_0(%arg0: i32) -> (i32, i32) {
    %c0_i32 = arith.constant 0 : i32
    %c0_i32_0 = arith.constant 0 : i32
    return %c0_i32, %arg0 : i32, i32
  }
  func.func @transform_1(%arg0: i32) -> (i32, i32) {
    %c0_i32 = arith.constant 0 : i32
    %c0_i32_0 = arith.constant 0 : i32
    %c0_i32_1 = arith.constant 0 : i32
    return %c0_i32, %c0_i32_0 : i32, i32
  }
  func.func @transform_2(%arg0: i32) -> (i32, i32) {
    %c0_i32 = arith.constant 0 : i32
    %c0_i32_0 = arith.constant 0 : i32
    %c0_i32_1 = arith.constant 0 : i32
    return %c0_i32, %c0_i32_0 : i32, i32
  }
  func.func @transform_3(%arg0: i32) -> (i32, i32) {
    %c0_i32 = arith.constant 0 : i32
    %c0_i32_0 = arith.constant 0 : i32
    %c0_i32_1 = arith.constant 0 : i32
    return %c0_i32, %c0_i32_0 : i32, i32
  }
  func.func @transform_4(%arg0: i32) -> i32 {
    %c0_i32 = arith.constant 0 : i32
    %c0_i32_0 = arith.constant 0 : i32
    return %c0_i32 : i32
  }
  func.func @transform_5(%arg0: i32) -> (i32, i32) {
    %c0_i32 = arith.constant 0 : i32
    %c0_i32_0 = arith.constant 0 : i32
    return %c0_i32, %arg0 : i32, i32
  }
}

</mosaic_0001>

<bundles_post_ra>
// kernel: tpu_custom_call.1
= control target key start
LH: loop header
LB: loop body
LE: loop exit
PB: predicated region body
PF: predicated region fallthrough
CT: control target
= control target key end

     0   :  { %s973_s0 = inlined_call_operand.vmem [shape: f32[1,2048], index: 0, kind: input, shape index: {}]   ;;  %s974_s1 = inlined_call_operand.vmem [shape: f32[32,1], index: 1, kind: input, shape index: {}]   ;;  %s975_s2 = inlined_call_operand.vmem [shape: f32[32,1], index: 2, kind: input, shape index: {}]   ;;  %s976_s3 = inlined_call_operand.vmem [shape: f32[32,1], index: 3, kind: input, shape index: {}]   ;;  %s977_s4 = inlined_call_operand.<no memory space> [shape: f32[1], index: 4, kind: input, shape index: {}]   ;;  %s978_s5 = inlined_call_operand.hbm [shape: f32[1,2048], index: 5, kind: output, shape index: {}]  }
   0x1   :  { %10 = sst [smem:[#allocation2]] %s977_s4 }
   0x2   :  { %11 = vsyncpa [#allocation4], 0 }
   0x3   :  { %13 = vsyncpa [#allocation4 + $0x1], 0  ;;  %s842_s20 = smov 0   ;;  %s844_s21 = smov 0  }
   0x4   :  { %s846_s22 = smov 0   ;;  %s848_s23 = smov 0  }
   0x5 LB: > { %s863_s4 = sadd.s32 4294967295, %s804_s23   ;;  %s609_s24 = sadd.s32 4294967294, %s804_s23   ;;  %s804_s23 = sphi %s848_s23, %s984_s23   ;;  %s800_s22 = sphi %s846_s22, %s983_s22   ;;  %s796_s21 = sphi %s844_s21, %s982_s21   ;;  %s792_s20 = sphi %s842_s20, %s981_s20  }
   0x6   : > { %s867_s25 = sadd.s32 1, %s804_s23   ;;  %s136_s26 = sadd.s32 1, %s800_s22 }
   0x7   : > { %s133_s27 = ssub.s32 %s804_s23, %s867_s25  ;;  %p146_p0 = scmp.ne.s32.totalorder %s800_s22, %s796_s21 }
   0x8   : > { %p134_p1 = scmp.eq.s32.totalorder %s133_s27, 0  ;;  %p147_p2 = scmp.eq.s32.totalorder %s863_s4, 3 }
   0x9   : > { %p152_p3 = scmp.ne.s32.totalorder %s796_s21, %s792_s20  ;;  %p153_p4 = scmp.eq.s32.totalorder %s609_s24, 3 }
   0xa   : > { %s878_s28 = scalar_select %p134_p1, %s800_s22, %s136_s26  }
   0xb   : > { %p880_p5 = por %p147_p2, %p146_p0  ;;  %p884_p6 = por %p153_p4, %p152_p3 }
   0xc   : > { %p612_p7 = scmp.ge.s32.totalorder %s804_s23, 1  ;;  %p191_p8 = scmp.lt.s32.totalorder %s804_s23, 5 }
   0xe   : > { %p192_p9 = pnand %p612_p7, %p191_p8 }
   0xf   : > { %s614_s13 = sshll.u32 (!%p192_p9), %s863_s4, 2  ;;  %s498_s17 = sld [smem:[#allocation2]] (!%p192_p9) }
  0x10   : > { %195 = sbr.rel (%p192_p9) target bundleno = 244 (0xf4), region = 40  ;;  %p219_p10 = scmp.lt.s32.totalorder (!%p192_p9), %s614_s13, 15 }
  0x11   : > { %s215_s18 = sand.u32 (!%p192_p9), 1, %s796_s21   ;;  %s636_s24 = sshll.u32 (!%p192_p9), %s863_s4, 6 }
  0x12   : > { %s613_s19 = sshll.u32 (!%p192_p9), %s215_s18, 2  ;;  %s551_s8 = scalar_lea.hbm (!%p192_p9), %s978_s5, %s636_s24 }
  0x13   : > { %s217_s26 = scalar_lea.vmem (!%p192_p9), [#allocation3], %s613_s19  ;;  %s539_s9 = scalar_lea.sflag (!%p192_p9), [#allocation4], %s215_s18 }
  0x14   : > { %s553_s27 = sshll.u32 (!%p192_p9), %s217_s26, 4  ;;  %s808_s11 = smov (!%p192_p9), [#allocation3]   ;;  %s554_s27 = int_to_ptr.vmem [resolvable:$true] %s553_s27 }
  0x15   : > { %v227_v0 = vld [vmem:[%s974_s1 + $0x10] sm:$0xff]  ;;  %v225_v1 = vld [vmem:[%s974_s1] sm:$0xff]  ;;  %v806_v2 = vmov 0   ;;  %v226_v4 = vld [vmem:[%s974_s1 + $0x8] sm:$0xff]  ;;  %v250_v13 = vlaneseq  ;;  %s986_s13 = smov (!%p219_p10, %s614_s13), 15  ;;  %s744_s10 = scalar_lea.vmem %s554_s27, 64 }
  0x16   : > { %679 = vset.pattern.permute.xlu1 %v806_v2  ;;  %678 = vset.pattern.permute.xlu0 %v806_v2  ;;  %v286_v3 = vld [vmem:[%s975_s2] sm:$0xff]  ;;  %v228_v5 = vld [vmem:[%s974_s1 + $0x18] sm:$0xff]  ;;  %v287_v6 = vld [vmem:[%s975_s2 + $0x8] sm:$0xff]  ;;  %s221_s16 = scalar_lea.vmem %s973_s0, %s986_s13  ;;  %p745_p11 = scmp.ne.s32.totalorder %s554_s27, %s744_s10 }
  0x17   : > { %241 = vperm.xlu1 %679, %v227_v0   ;;  %231 = vperm.xlu0 %678, %v225_v1   ;;  %v289_v7 = vld [vmem:[%s975_s2 + $0x18] sm:$0xff]  ;;  %v288_v8 = vld [vmem:[%s975_s2 + $0x10] sm:$0xff]  ;;  %v423_v9 = vld [vmem:[%s976_s3 + $0x8] sm:$0xff]  ;;  %v928_v14 = vshrl.u32 %v250_v13, 7  ;;  %vm535_vm0 = vcmp.lt.s32.totalorder %v250_v13, 512  ;;  %s748_s4 = sshll.u32 %s808_s11, 4  ;;  %s749_s4 = int_to_ptr.vmem [resolvable:$false] %s748_s4 }
  0x18   : > { %v422_v10 = vld [vmem:[%s976_s3] sm:$0xff]  ;;  %v425_v11 = vld [vmem:[%s976_s3 + $0x18] sm:$0xff]  ;;  %v424_v12 = vld [vmem:[%s976_s3 + $0x10] sm:$0xff]  ;;  %p746_p12 = pnand %p745_p11, %p880_p5  ;;  %s750_s12 = scalar_lea.vmem %s749_s4, 128 }
  0x19   : > { %v252_v15 = vsub.s32 0, %v928_v14  ;;  %v256_v16 = vsub.s32 1, %v928_v14  ;;  %v260_v17 = vsub.s32 2, %v928_v14  ;;  %v264_v18 = vsub.s32 3, %v928_v14  ;;  %v224_v19 = vld [vmem:[%s221_s16] sm:$0xf]  ;;  %p751_p0 = scmp.lt.s32.totalorder %s554_s27, %s749_s4  ;;  %p752_p1 = scmp.lt.s32.totalorder %s750_s12, %s744_s10 }
  0x1a   : > { %p747_p13 = pneg %p746_p12 }
  0x1b   : > { %292 = vperm.xlu1 %679, %v286_v3   ;;  %236 = vperm.xlu0 %678, %v226_v4   ;;  %v253_v20 = vrot.slane %v224_v19, %v252_v15  ;;  %v257_v21 = vrot.slane %v224_v19, %v256_v16  ;;  %v261_v22 = vrot.slane %v224_v19, %v260_v17  ;;  %p753_p2 = por %p752_p1, %p751_p0 }
  0x1c   : > { %v265_v23 = vrot.slane %v224_v19, %v264_v18 }
  0x1d   : > { %p754_p3 = pnand %p753_p2, %p747_p13 }
  0x1f   : > { %246 = vperm.xlu1 %679, %v228_v5   ;;  %297 = vperm.xlu0 %678, %v287_v6  }
  0x23   : > { %307 = vperm.xlu1 %679, %v289_v7   ;;  %302 = vperm.xlu0 %678, %v288_v8  }
  0x27   : > { %433 = vperm.xlu1 %679, %v423_v9   ;;  %428 = vperm.xlu0 %678, %v422_v10  }
  0x2b   : > { %443 = vperm.xlu1 %679, %v425_v11   ;;  %438 = vperm.xlu0 %678, %v424_v12  }
  0x92   : > { %v242_v24 = vpop.permute.xlu1 %241  ;;  %v232_v25 = vpop.permute.xlu0 %231 }
  0x93   : > { %v270_v26 = vmul.f32 %v253_v20, %v232_v25  ;;  %v271_v27 = vmul.f32 %v257_v21, %v232_v25  ;;  %v272_v28 = vmul.f32 %v261_v22, %v232_v25  ;;  %v273_v29 = vmul.f32 %v265_v23, %v232_v25 }
  0x94   : > { %v278_v36 = vmul.f32 %v253_v20, %v242_v24  ;;  %v279_v37 = vmul.f32 %v257_v21, %v242_v24  ;;  %v280_v41 = vmul.f32 %v261_v22, %v242_v24  ;;  %v281_v11 = vmul.f32 %v265_v23, %v242_v24 }
  0x96   : > { %v293_v30 = vpop.permute.xlu1 %292  ;;  %v237_v31 = vpop.permute.xlu0 %236 }
  0x97   : > { %v310_v32 = vadd.f32 %v293_v30, %v270_v26  ;;  %v311_v33 = vadd.f32 %v293_v30, %v271_v27  ;;  %v312_v34 = vadd.f32 %v293_v30, %v272_v28  ;;  %v313_v35 = vadd.f32 %v293_v30, %v273_v29 }
  0x98   : > { %v274_v43 = vmul.f32 %v253_v20, %v237_v31  ;;  %v275_v44 = vmul.f32 %v257_v21, %v237_v31  ;;  %v276_v47 = vmul.f32 %v261_v22, %v237_v31  ;;  %v277_v48 = vmul.f32 %v265_v23, %v237_v31 }
  0x99   : > { %v615_v38 = vmul.f32 -1.442695, %v310_v32  ;;  %v616_v39 = vmul.f32 -1.442695, %v311_v33  ;;  %v617_v40 = vmul.f32 -1.442695, %v312_v34 }
  0x9a   : > { %v618_v42 = vmul.f32 -1.442695, %v313_v35  ;;  %v247_v45 = vpop.permute.xlu1 %246  ;;  %v298_v46 = vpop.permute.xlu0 %297 }
  0x9b   : > { %680 = vpow2.f32 %v615_v38  ;;  %v282_v49 = vmul.f32 %v253_v20, %v247_v45  ;;  %v283_v50 = vmul.f32 %v257_v21, %v247_v45  ;;  %v314_v51 = vadd.f32 %v298_v46, %v274_v43 }
  0x9c   : > { %682 = vpow2.f32 %v616_v39  ;;  %v315_v52 = vadd.f32 %v298_v46, %v275_v44  ;;  %v284_v53 = vmul.f32 %v261_v22, %v247_v45  ;;  %v316_v54 = vadd.f32 %v298_v46, %v276_v47 }
  0x9d   : > { %684 = vpow2.f32 %v617_v40  ;;  %v317_v55 = vadd.f32 %v298_v46, %v277_v48  ;;  %v285_v56 = vmul.f32 %v265_v23, %v247_v45  ;;  %v619_v57 = vmul.f32 -1.442695, %v314_v51 }
  0x9e   : > { %686 = vpow2.f32 %v618_v42  ;;  %v620_v58 = vmul.f32 -1.442695, %v315_v52  ;;  %v308_v59 = vpop.permute.xlu1 %307  ;;  %v303_v60 = vpop.permute.xlu0 %302  ;;  %v621_v61 = vmul.f32 -1.442695, %v316_v54 }
  0x9f   : > { %v622_v62 = vmul.f32 -1.442695, %v317_v55  ;;  %v322_v63 = vadd.f32 %v308_v59, %v282_v49  ;;  %v323_v0 = vadd.f32 %v308_v59, %v283_v50  ;;  %688 = vpow2.f32 %v619_v57 }
  0xa0   : > { %v324_v1 = vadd.f32 %v308_v59, %v284_v53  ;;  %v325_v2 = vadd.f32 %v308_v59, %v285_v56  ;;  %v318_v3 = vadd.f32 %v303_v60, %v278_v36  ;;  %690 = vpow2.f32 %v620_v58 }
  0xa1   : > { %v627_v4 = vmul.f32 -1.442695, %v322_v63  ;;  %v628_v5 = vmul.f32 -1.442695, %v323_v0  ;;  %v319_v6 = vadd.f32 %v303_v60, %v279_v37  ;;  %692 = vpow2.f32 %v621_v61 }
  0xa2   : > { %v629_v7 = vmul.f32 -1.442695, %v324_v1  ;;  %v320_v8 = vadd.f32 %v303_v60, %v280_v41  ;;  %694 = vpow2.f32 %v622_v62  ;;  %v630_v9 = vmul.f32 -1.442695, %v325_v2  ;;  %v429_v55 = vpop.permute.xlu0 %428  ;;  %v434_v58 = vpop.permute.xlu1 %433 }
  0xa3   : > { %696 = vpow2.f32 %v627_v4  ;;  %v623_v10 = vmul.f32 -1.442695, %v318_v3  ;;  %v624_v12 = vmul.f32 -1.442695, %v319_v6  ;;  %v321_v16 = vadd.f32 %v303_v60, %v281_v11 }
  0xa4   : > { %698 = vpow2.f32 %v628_v5  ;;  %v625_v15 = vmul.f32 -1.442695, %v320_v8 }
  0xa5   : > { %700 = vpow2.f32 %v629_v7  ;;  %v626_v25 = vmul.f32 -1.442695, %v321_v16 }
  0xa6   : > { %702 = vpow2.f32 %v630_v9  ;;  %v439_v4 = vpop.permute.xlu0 %438 }
  0xa7   : > { %704 = vpow2.f32 %v623_v10  ;;  %v444_v10 = vpop.permute.xlu1 %443 }
  0xa8   : > { %v681_v17 = vpop.eup %680  ;;  %706 = vpow2.f32 %v624_v12 }
  0xa9   : > { %v683_v18 = vpop.eup %682  ;;  %v374_v19 = vadd.f32 1.0, %v681_v17  ;;  %708 = vpow2.f32 %v625_v15 }
  0xaa   : > { %v685_v20 = vpop.eup %684  ;;  %v375_v21 = vadd.f32 1.0, %v683_v18 }
  0xab   : > { %v687_v22 = vpop.eup %686  ;;  %v376_v26 = vadd.f32 1.0, %v685_v20  ;;  %710 = vrcp.f32 %v374_v19 }
  0xac   : > { %v689_v27 = vpop.eup %688  ;;  %712 = vrcp.f32 %v375_v21  ;;  %v377_v44 = vadd.f32 1.0, %v687_v22 }
  0xad   : > { %v691_v23 = vpop.eup %690  ;;  %v378_v24 = vadd.f32 1.0, %v689_v27  ;;  %714 = vpow2.f32 %v626_v25 }
  0xae   : > { %v693_v28 = vpop.eup %692  ;;  %v379_v29 = vadd.f32 1.0, %v691_v23  ;;  %716 = vrcp.f32 %v376_v26 }
  0xaf   : > { %v695_v30 = vpop.eup %694  ;;  %v380_v31 = vadd.f32 1.0, %v693_v28  ;;  %718 = vrcp.f32 %v378_v24 }
  0xb0   : > { %v697_v32 = vpop.eup %696  ;;  %v381_v33 = vadd.f32 1.0, %v695_v30  ;;  %720 = vrcp.f32 %v379_v29 }
  0xb1   : > { %v699_v34 = vpop.eup %698  ;;  %v386_v35 = vadd.f32 1.0, %v697_v32  ;;  %722 = vrcp.f32 %v380_v31 }
  0xb2   : > { %v701_v36 = vpop.eup %700  ;;  %v387_v37 = vadd.f32 1.0, %v699_v34  ;;  %724 = vrcp.f32 %v381_v33 }
  0xb3   : > { %v703_v38 = vpop.eup %702  ;;  %v388_v39 = vadd.f32 1.0, %v701_v36  ;;  %726 = vrcp.f32 %v386_v35 }
  0xb4   : > { %v705_v40 = vpop.eup %704  ;;  %728 = vrcp.f32 %v387_v37  ;;  %v389_v48 = vadd.f32 1.0, %v703_v38 }
  0xb5   : > { %v707_v41 = vpop.eup %706  ;;  %v382_v42 = vadd.f32 1.0, %v705_v40  ;;  %730 = vrcp.f32 %v388_v39 }
  0xb6   : > { %v709_v43 = vpop.eup %708  ;;  %v383_v45 = vadd.f32 1.0, %v707_v41 }
  0xb7   : > { %v384_v46 = vadd.f32 1.0, %v709_v43  ;;  %732 = vrcp.f32 %v382_v42 }
  0xb8   : > { %734 = vrcp.f32 %v383_v45  ;;  %v711_v47 = vpop.eup %710 }
  0xb9   : > { %736 = vrcp.f32 %v384_v46  ;;  %v713_v49 = vpop.eup %712  ;;  %v446_v1 = vmul.f32 %v711_v47, %v429_v55 }
  0xba   : > { %738 = vrcp.f32 %v377_v44  ;;  %v715_v50 = vpop.eup %714  ;;  %v447_v3 = vmul.f32 %v713_v49, %v429_v55 }
  0xbb   : > { %v717_v51 = vpop.eup %716  ;;  %v385_v52 = vadd.f32 1.0, %v715_v50  ;;  %740 = vrcp.f32 %v389_v48  ;;  %v807_v50 = vmov 1966171168  }
  0xbc   : > { %v719_v53 = vpop.eup %718  ;;  %v448_v6 = vmul.f32 %v717_v51, %v429_v55  ;;  %v511_v51 = vunpack.c.l.s4 %v807_v50 }
  0xbd   : > { %v721_v54 = vpop.eup %720  ;;  %742 = vrcp.f32 %v385_v52  ;;  %v450_v60 = vmul.f32 %v719_v53, %v434_v58 }
  0xbe   : > { %v723_v56 = vpop.eup %722  ;;  %v451_v62 = vmul.f32 %v721_v54, %v434_v58  ;;  %v499_v54 = vstv %s498_s17 }
  0xbf   : > { %v725_v57 = vpop.eup %724  ;;  %v452_v0 = vmul.f32 %v723_v56, %v434_v58  ;;  %v462_v8 = vadd.f32 %v450_v60, %v446_v1 }
  0xc0   : > { %v727_v59 = vpop.eup %726  ;;  %v471_v12 = vadd.f32 %v451_v62, %v447_v3  ;;  %v453_v20 = vmul.f32 %v725_v57, %v434_v58 }
  0xc1   : > { %v729_v61 = vpop.eup %728  ;;  %v458_v16 = vmul.f32 %v727_v59, %v444_v10  ;;  %v480_v19 = vadd.f32 %v452_v0, %v448_v6  ;;  %v512_v59 = vunpack.c.0.s8 %v511_v51 }
  0xc2   : > { %v731_v63 = vpop.eup %730  ;;  %v459_v21 = vmul.f32 %v729_v61, %v444_v10 }
  0xc3   : > { %v460_v25 = vmul.f32 %v731_v63, %v444_v10 }
  0xc4   : > { %v733_v2 = vpop.eup %732 }
  0xc5   : > { %v735_v5 = vpop.eup %734  ;;  %v454_v7 = vmul.f32 %v733_v2, %v439_v4 }
  0xc6   : > { %v737_v9 = vpop.eup %736  ;;  %v455_v11 = vmul.f32 %v735_v5, %v439_v4 }
  0xc7   : > { %v739_v15 = vpop.eup %738  ;;  %v456_v17 = vmul.f32 %v737_v9, %v439_v4  ;;  %v463_v18 = vadd.f32 %v462_v8, %v454_v7 }
  0xc8   : > { %v472_v22 = vadd.f32 %v471_v12, %v455_v11  ;;  %v741_v23 = vpop.eup %740  ;;  %v449_v24 = vmul.f32 %v739_v15, %v429_v55 }
  0xc9   : > { %v464_v26 = vadd.f32 %v463_v18, %v458_v16  ;;  %v481_v27 = vadd.f32 %v480_v19, %v456_v17  ;;  %v461_v37 = vmul.f32 %v741_v23, %v444_v10 }
  0xca   : > { %v473_v28 = vadd.f32 %v472_v22, %v459_v21  ;;  %v743_v29 = vpop.eup %742  ;;  %v489_v34 = vadd.f32 %v453_v20, %v449_v24 }
  0xcb   : > { %v465_v30 = vrot.slane %v464_v26, 4  ;;  %v482_v31 = vadd.f32 %v481_v27, %v460_v25  ;;  %v457_v32 = vmul.f32 %v743_v29, %v439_v4  ;;  %v515_v4 = vsub.s32 %v512_v59, %v928_v14 }
  0xcc   : > { %v474_v33 = vrot.slane %v473_v28, 4 }
  0xcd   : > { %v466_v35 = vadd.f32 %v465_v30, %v464_v26  ;;  %v483_v36 = vrot.slane %v482_v31, 4  ;;  %v490_v39 = vadd.f32 %v489_v34, %v457_v32 }
  0xce   : > { %v475_v38 = vadd.f32 %v474_v33, %v473_v28 }
  0xcf   : > { %v467_v40 = vrot.slane %v466_v35, 2  ;;  %v484_v41 = vadd.f32 %v483_v36, %v482_v31  ;;  %v491_v43 = vadd.f32 %v490_v39, %v461_v37 }
  0xd0   : > { %v476_v42 = vrot.slane %v475_v38, 2 }
  0xd1   : > { %v468_v44 = vadd.f32 %v467_v40, %v466_v35  ;;  %v485_v45 = vrot.slane %v484_v41, 2  ;;  %v492_v47 = vrot.slane %v491_v43, 4 }
  0xd2   : > { %v477_v46 = vadd.f32 %v476_v42, %v475_v38 }
  0xd3   : > { %v469_v48 = vrot.slane %v468_v44, 1  ;;  %v486_v49 = vadd.f32 %v485_v45, %v484_v41  ;;  %v493_v53 = vadd.f32 %v492_v47, %v491_v43 }
  0xd4   : > { %v478_v52 = vrot.slane %v477_v46, 1 }
  0xd5   : > { %v470_v55 = vadd.f32 %v469_v48, %v468_v44  ;;  %v487_v56 = vrot.slane %v486_v49, 1  ;;  %v494_v58 = vrot.slane %v493_v53, 2 }
  0xd6   : > { %v479_v57 = vadd.f32 %v478_v52, %v477_v46 }
  0xd7   : > { %v488_v60 = vadd.f32 %v487_v56, %v486_v49  ;;  %v495_v61 = vadd.f32 %v494_v58, %v493_v53  ;;  %v500_v62 = vadd.f32 %v499_v54, %v470_v55 }
  0xd8   : > { %v501_v63 = vadd.f32 %v499_v54, %v479_v57 }
  0xd9   : > { %v496_v0 = vrot.slane %v495_v61, 1  ;;  %v502_v2 = vadd.f32 %v499_v54, %v488_v60 }
  0xda   : > { %v508_v3 = vcombine.low %v500_v62, %v501_v63 }
  0xdb   : > { %v497_v1 = vadd.f32 %v496_v0, %v495_v61 }
  0xdc   : > { %v516_v7 = vrot.slane %v508_v3, %v515_v4 }
  0xdd   : > { %v503_v5 = vadd.f32 %v499_v54, %v497_v1 }
  0xdf   : > { %v509_v6 = vcombine.low %v502_v2, %v503_v5 }
  0xe1   : > { %v523_v8 = vrot.slane %v509_v6, %v515_v4 }
  0xe3   : > { %v524_v9 = vcombine.low %v516_v7, %v523_v8 }
  0xe5   : > { %v531_v10 = vrot.slane %v524_v9, %v515_v4 }
  0xe7   : > { %537 = vst.msk [vmem:[%s217_s26] sm:$0xf] %vm535_vm0, %v531_v10 }
  0xe8   : > { %757 = shalt.err (!%p754_p3)
}
  0xe9   : > { %s758_s13 = scalar_lea.hbm %s551_s8, 64  ;;  %s762_s16 = scalar_lea.hbm %s978_s5, 256 }
  0xea   : > { %p759_p4 = scmp.ne.s32.totalorder %s551_s8, %s758_s13  ;;  %p763_p9 = scmp.lt.s32.totalorder %s551_s8, %s978_s5 }
  0xeb   : > { %p764_p10 = scmp.lt.s32.totalorder %s762_s16, %s758_s13 }
  0xec   : > { %p760_p7 = pnand %p759_p4, %p880_p5 }
  0xed   : > { %p765_p11 = por %p764_p10, %p763_p9 }
  0xee   : > { %p761_p8 = pneg %p760_p7 }
  0xf0   : > { %p766_p12 = pnand %p765_p11, %p761_p8 }
  0xf2   : > { %769 = shalt.err (!%p766_p12)
}
  0xf3   : > { %637 = dma.vmem_to_hbm [thread:$0]  (%p880_p5), %s554_s27, 64, %s551_s8, %s539_s9  }
  0xf4 PF: > { %p643_p13 = scmp.ge.s32.totalorder %s804_s23, 2  ;;  %s565_s19 = sand.u32 1, %s792_s20  }
  0xf5   : > { %s566_s24 = scalar_lea.sflag [#allocation4], %s565_s19 }
  0xf6   : > { %p640_p0 = pnand %p643_p13, %p884_p6 }
  0xf8   : > { %p641_p1 = pneg %p640_p0 }
  0xfa   : > { %787 = dma.done.wait (%p641_p1), %s566_s24, 64  }
  0xfb   : > { %789 = vsyncadd (%p641_p1), %s566_s24, 4294967232  ;;  %p16_p2 = scmp.ge.s32.totalorder %s867_s25, 6   ;;  %s981_s20 = smov %s796_s21 }
  0xfc   : > { %s982_s21 = smov %s800_s22  ;;  %s983_s22 = smov %s878_s28 }
  0xfd   : > { %s984_s23 = smov %s867_s25  ;;  %18 = sbr.rel (!%p16_p2) target bundleno = 5 (0x5), region = 75 }
 0x102   :  { %571 = vsyncpa [#allocation4], 1 }
 0x103   :  { %573 = vsyncpa [#allocation4 + $0x1], 1 }

</bundles_post_ra>
